<compile_context>
chip_gen: v7x
topology: tpu7x:2x2x1
jax: 0.10.0
libtpu: 0.0.40
codegen_flags: <defaults>
</compile_context>

<pallas_src>
import jax
import jax.numpy as jnp
from jax.experimental import pallas as pl
from jax.experimental.pallas import tpu as pltpu


_VMEM_BUDGET_BYTES = 12 * 1024 * 1024   # conservative vs v5e's 16 MiB default scoped VMEM


def _cdiv(a, b):
    return -(-a // b)


def _round_down(a, b):
    return (a // b) * b


def _round_up(a, b):
    return _cdiv(a, b) * b


def _mask_mul_kernel(blk_ref, x_ref, keep_ref, o_ref):
    # blk_ref: int32 lane-block schedule in SMEM; consumed by the index_maps only.
    del blk_ref
    o_ref[...] = x_ref[...] * keep_ref[...]


def _sample_offsets(key, h, w, rh, rw):
    # Python's random.randint(a, b) is inclusive on both ends.
    k1, k2 = jax.random.split(key)
    sx = jax.random.randint(k1, (), 0, h - rh + 1, dtype=jnp.int32)
    sy = jax.random.randint(k2, (), 0, w - rw + 1, dtype=jnp.int32)
    return sx, sy


def _pick_rows(m, lane_elems, itemsize, sub, max_block_bytes):
    """Rows per block: sublane-aligned, within budget, >=2 M-steps when possible (v7x)."""
    row_bytes = lane_elems * itemsize
    max_rows = max(1, max_block_bytes // row_bytes)
    if max_rows >= m:
        if m > sub:   # give v7x's second TensorCore something to do
            return min(m, _round_up(_cdiv(m, 2), sub))
        return m
    return max(sub, _round_down(max_rows, sub))


def batch_drop(x, h_ratio, w_ratio, key, *, training=True,
               target_block_bytes=3 * 1024 * 1024):
    """Pallas implementation of BatchDrop.forward.  x: (N, C, H, W)."""
    if not training:
        return x

    n, c, h, w = x.shape
    rh = int(round(h_ratio * h))
    rw = int(round(w_ratio * w))
    if rh <= 0 or rw <= 0:
        return x                              # empty rectangle -> identity

    sx, sy = _sample_offsets(key, h, w, rh, rw)

    m, l = n * c, h * w
    x_flat = x.reshape(m, l)

    # (1, L) keep-mask (1 outside the rectangle, 0 inside), built once here so
    # the kernel is a pure broadcast multiply.
    pix = jnp.arange(l, dtype=jnp.int32)
    row = pix // w
    col = pix - row * w
    drop = (row >= sx) & (row < sx + rh) & (col >= sy) & (col < sy + rw)
    keep = jnp.where(drop, 0, 1).astype(x.dtype).reshape(1, l)

    itemsize = jnp.dtype(x.dtype).itemsize
    sub = max(8, 32 // itemsize)              # native sublane packing per dtype
    max_block_bytes = min(target_block_bytes, _VMEM_BUDGET_BYTES // 4)

    # ---------------- windowed, aliased fast path -------------------------
    span = (rh - 1) * w + rw                  # flattened extent of the rectangle
    use_window = (l % 128 == 0)
    if use_window:
        tl = 256 if l % 256 == 0 else 128     # >=512B contiguous per DMA row
        n_win = _cdiv(span, tl) + 1           # static bound on touched lane blocks
        use_window = n_win * tl < l           # only if it actually saves traffic

    if use_window:
        tb = _pick_rows(m, tl, itemsize, sub, max_block_bytes)
        grid = (_cdiv(m, tb), n_win)

        s0 = sx * w + sy
        first = s0 // tl
        last = (s0 + span - 1) // tl
        # Non-decreasing schedule; tail steps clamp to the last touched block
        # (consecutive revisits are idempotent and their DMAs are skipped).
        blk_ids = jnp.minimum(first + jnp.arange(n_win, dtype=jnp.int32),
                              last).astype(jnp.int32)

        out_flat = pl.pallas_call(
            _mask_mul_kernel,
            out_shape=jax.ShapeDtypeStruct((m, l), x.dtype),
            grid_spec=pltpu.PrefetchScalarGridSpec(
                num_scalar_prefetch=1,
                grid=grid,
                in_specs=[
                    pl.BlockSpec((tb, tl), lambda i, j, blk: (i, blk[j])),
                    pl.BlockSpec((1, tl), lambda i, j, blk: (0, blk[j])),
                ],
                out_specs=pl.BlockSpec((tb, tl), lambda i, j, blk: (i, blk[j])),
            ),
            # Alias x -> out: lane blocks outside the schedule are never read
            # or written; they keep their original values through the alias.
            input_output_aliases={1: 0},
            compiler_params=pltpu.CompilerParams(
                dimension_semantics=("parallel", "arbitrary")),
            cost_estimate=pl.CostEstimate(
                flops=m * n_win * tl,
                transcendentals=0,
                bytes_accessed=2 * m * n_win * tl * itemsize + l * itemsize),
        )(blk_ids, x_flat, keep)
        return out_flat.reshape(n, c, h, w)

    # ---------------- dense fallback (whole slab streamed) ----------------
    if sub * l * itemsize <= max_block_bytes or l <= 128:
        tl, n_l = l, 1
    else:
        # Very large spatial maps: lane-tile L so even a minimal-row block
        # fits the VMEM budget (v7x 64 MiB physical / v5e 16 MiB default).
        tl = max(128, _round_down(max_block_bytes // (sub * itemsize), 128))
        n_l = _cdiv(l, tl)
    tb = _pick_rows(m, tl, itemsize, sub, max_block_bytes)
    grid = (_cdiv(m, tb), n_l)

    dummy = jnp.zeros((1,), jnp.int32)        # unused scalar-prefetch slot

    out_flat = pl.pallas_call(
        _mask_mul_kernel,
        out_shape=jax.ShapeDtypeStruct((m, l), x.dtype),
        grid_spec=pltpu.PrefetchScalarGridSpec(
            num_scalar_prefetch=1,
            grid=grid,
            in_specs=[
                pl.BlockSpec((tb, tl), lambda i, j, blk: (i, j)),
                pl.BlockSpec((1, tl), lambda i, j, blk: (0, j)),   # resident mask
            ],
            out_specs=pl.BlockSpec((tb, tl), lambda i, j, blk: (i, j)),
        ),
        compiler_params=pltpu.CompilerParams(
            dimension_semantics=("parallel", "parallel")),
        cost_estimate=pl.CostEstimate(
            flops=m * l,
            transcendentals=0,
            bytes_accessed=2 * m * l * itemsize + l * itemsize),
    )(dummy, x_flat, keep)
    return out_flat.reshape(n, c, h, w)


if __name__ == "__main__":
    key = jax.random.PRNGKey(0)
    kx1, kx2, kdrop1, kdrop2 = jax.random.split(key, 4)

    h_ratio, w_ratio = 0.3, 0.3

    def reference(x, drop_key):
        n_, c_, h_, w_ = x.shape
        rh = int(round(h_ratio * h_))
        rw = int(round(w_ratio * w_))
        sx, sy = _sample_offsets(drop_key, h_, w_, rh, rw)
        sx, sy = int(sx), int(sy)
        mask = jnp.ones_like(x)
        mask = mask.at[:, :, sx:sx + rh, sy:sy + rw].set(0)
        return x * mask

    # Test 1: small NCHW input (module's typical shape) -> dense streaming path.
    x1 = jax.random.normal(kx1, (2, 4, 16, 16), dtype=jnp.float32)
    out1 = jax.block_until_ready(
        batch_drop(x1, h_ratio, w_ratio, kdrop1, training=True))
    assert jnp.allclose(out1, reference(x1, kdrop1)), "dense path mismatch"

    # Test 2: larger spatial map -> windowed / aliased fast path
    # (only the lane blocks intersecting the rectangle are read or written).
    x2 = jax.random.normal(kx2, (2, 4, 64, 64), dtype=jnp.float32)
    out2 = jax.block_until_ready(
        batch_drop(x2, h_ratio, w_ratio, kdrop2, training=True))
    assert jnp.allclose(out2, reference(x2, kdrop2)), "windowed path mismatch"

    # Eval mode is identity.
    out_eval = jax.block_until_ready(
        batch_drop(x1, h_ratio, w_ratio, kdrop1, training=False))
    assert jnp.allclose(out_eval, x1)

    print("KERNEL_OK")
</pallas_src>

<mosaic_0001>
module attributes {stable_mosaic.version = 11 : i64} {
  func.func @_mask_mul_kernel(%arg0: i32, %arg1: i32, %arg2: memref<1xi32, #tpu.memory_space<smem>>, %arg3: memref<8x256xf32, #tpu.memory_space<vmem>>, %arg4: memref<1x256xf32, #tpu.memory_space<vmem>>, %arg5: memref<8x256xf32, #tpu.memory_space<vmem>>) attributes {dimension_semantics = [#tpu.dimension_semantics<parallel>, #tpu.dimension_semantics<parallel>], iteration_bounds = array<i64: 1, 1>, scalar_prefetch = 1 : i64, scratch_operands = 0 : i64, tpu.core_type = #tpu.core_type<tc>, window_params = [{transform_indices = @transform_0, window_bounds = array<i64: 8, 256>}, {transform_indices = @transform_1, window_bounds = array<i64: 1, 256>}, {transform_indices = @transform_2, window_bounds = array<i64: 8, 256>}]} {
    %c0 = arith.constant 0 : index
    %c0_0 = arith.constant 0 : index
    %0 = vector.load %arg3[%c0, %c0_0] : memref<8x256xf32, #tpu.memory_space<vmem>>, vector<8x256xf32>
    %c0_1 = arith.constant 0 : index
    %c0_2 = arith.constant 0 : index
    %1 = vector.load %arg4[%c0_1, %c0_2] : memref<1x256xf32, #tpu.memory_space<vmem>>, vector<1x256xf32>
    %2 = vector.broadcast %1 : vector<1x256xf32> to vector<8x256xf32>
    %3 = arith.mulf %0, %2 : vector<8x256xf32>
    %c0_3 = arith.constant 0 : index
    %c0_4 = arith.constant 0 : index
    %4 = vector.load %arg5[%c0_3, %c0_4] : memref<8x256xf32, #tpu.memory_space<vmem>>, vector<8x256xf32>
    tpu.vector_store %arg5[%c0_3, %c0_4], %3 {strides = array<i32>} : memref<8x256xf32, #tpu.memory_space<vmem>>, vector<8x256xf32>,
    return
  }
  func.func @transform_0(%arg0: i32, %arg1: i32, %arg2: memref<1xi32, #tpu.memory_space<smem>>) -> (i32, i32) {
    %c0_i32 = arith.constant 0 : i32
    return %arg0, %arg1 : i32, i32
  }
  func.func @transform_1(%arg0: i32, %arg1: i32, %arg2: memref<1xi32, #tpu.memory_space<smem>>) -> (i32, i32) {
    %c0_i32 = arith.constant 0 : i32
    %c0_i32_0 = arith.constant 0 : i32
    return %c0_i32, %arg1 : i32, i32
  }
  func.func @transform_2(%arg0: i32, %arg1: i32, %arg2: memref<1xi32, #tpu.memory_space<smem>>) -> (i32, i32) {
    %c0_i32 = arith.constant 0 : i32
    return %arg0, %arg1 : i32, i32
  }
}

</mosaic_0001>

<bundles_post_ra>
// kernel: tpu_custom_call.1
= control target key start
LH: loop header
LB: loop body
LE: loop exit
PB: predicated region body
PF: predicated region fallthrough
CT: control target
= control target key end

     0   :  { %9 = vsyncpa [#allocation5], 0  ;;  %s158_s0 = inlined_call_operand.<no memory space> [shape: s32[1], index: 0, kind: input, shape index: {}]   ;;  %s159_s1 = inlined_call_operand.hbm [shape: f32[8,256], index: 1, kind: input, shape index: {}]   ;;  %s160_s2 = inlined_call_operand.vmem [shape: f32[1,256], index: 2, kind: input, shape index: {}]   ;;  %s161_s3 = inlined_call_operand.hbm [shape: f32[8,256], index: 3, kind: output, shape index: {}]  }
   0x1   :  { %10 = vsyncpa [#allocation6], 0  ;;  %s109_s12 = smov [#allocation4]   ;;  %s61_s16 = scalar_lea.hbm %s159_s1, 256 }
   0x2   :  { %s17_s13 = sshll.u32 %s109_s12, 4  ;;  %p62_p0 = scmp.ne.s32.totalorder %s159_s1, %s61_s16  ;;  %s18_s13 = int_to_ptr.vmem [resolvable:$true] %s17_s13 }
   0x3   :  { %p65_p1 = scmp.lt.u32.totalorder %s61_s16, %s159_s1 }
   0x5   :  { %p67_p2 = pnand %p65_p1, %p62_p0 }
   0x7   :  { %70 = shalt.err (!%p67_p2)
}
   0x8   :  { %s71_s20 = scalar_lea.vmem %s18_s13, 256  ;;  %p76_p4 = scmp.lt.s32.totalorder %s18_s13, %s18_s13 }
   0x9   :  { %p72_p3 = scmp.ne.s32.totalorder %s18_s13, %s71_s20  ;;  %p77_p5 = scmp.lt.s32.totalorder %s71_s20, %s71_s20 }
   0xb   :  { %p78_p6 = por %p77_p5, %p76_p4 }
   0xd   :  { %p79_p7 = pnand %p78_p6, %p72_p3 }
   0xf   :  { %82 = shalt.err (!%p79_p7)
}
  0x10   :  { %20 = dma.hbm_to_vmem [thread:$0]  %s159_s1, 256, %s18_s13, [#allocation5]  }
  0x11   :  { %105 = dma.done.wait [#allocation5], 256  }
  0x12   :  { %106 = vsyncadd [#allocation5], 4294967040  ;;  %v30_v0 = vlaneseq  ;;  %v26_v4 = vld [vmem:[#allocation4] sm:$0xff]  ;;  %v27_v6 = vld [vmem:[#allocation4 + $0x8] sm:$0xff]  ;;  %s110_s25 = smov [#allocation7]  }
  0x13   :  { %v28_v5 = vld [vmem:[%s160_s2] sm:$0x3]  ;;  %s50_s26 = sshll.u32 %s110_s25, 4  ;;  %s51_s26 = int_to_ptr.vmem [resolvable:$true] %s50_s26 }
  0x14   :  { %v31_v1 = vshrl.u32 %v30_v0, 7  ;;  %s83_s1 = scalar_lea.vmem %s51_s26, 256  ;;  %p88_p9 = scmp.lt.s32.totalorder %s51_s26, %s51_s26 }
  0x15   :  { %p84_p8 = scmp.ne.s32.totalorder %s51_s26, %s83_s1  ;;  %p89_p10 = scmp.lt.s32.totalorder %s83_s1, %s83_s1 }
  0x16   :  { %v32_v2 = vsub.s32 0, %v31_v1  ;;  %v36_v3 = vsub.s32 1, %v31_v1 }
  0x17   :  { %p90_p11 = por %p89_p10, %p88_p9 }
  0x18   :  { %v33_v7 = vrot.slane %v28_v5, %v32_v2  ;;  %v37_v8 = vrot.slane %v28_v5, %v36_v3 }
  0x19   :  { %p91_p12 = pnand %p90_p11, %p84_p8 }
  0x1a   :  { %v40_v9 = vmul.f32 %v33_v7, %v26_v4  ;;  %v41_v10 = vmul.f32 %v37_v8, %v27_v6 }
  0x1c   :  { %42 = vst [vmem:[#allocation7] sm:$0xff] %v40_v9  ;;  %43 = vst [vmem:[#allocation7 + $0x8] sm:$0xff] %v41_v10 }
  0x1d   :  { %94 = shalt.err (!%p91_p12)
}
  0x1e   :  { %s95_s2 = scalar_lea.hbm %s161_s3, 256 }
  0x1f   :  { %p96_p13 = scmp.ne.s32.totalorder %s161_s3, %s95_s2  ;;  %p99_p0 = scmp.lt.u32.totalorder %s95_s2, %s161_s3 }
  0x21   :  { %p101_p1 = pnand %p99_p0, %p96_p13 }
  0x23   :  { %104 = shalt.err (!%p101_p1)
}
  0x24   :  { %53 = dma.vmem_to_hbm [thread:$0]  %s51_s26, 256, %s161_s3, [#allocation6]  }
  0x25   :  { %107 = dma.done.wait [#allocation6], 256  }
  0x26   :  { %108 = vsyncadd [#allocation6], 4294967040 }
  0x27   :  { %57 = vsyncpa [#allocation5], 1 }
  0x28   :  { %58 = vsyncpa [#allocation6], 1 }

</bundles_post_ra>
